<compile_context>
chip_gen: v6e
topology: v6e:2x2x1
jax: 0.10.0
libtpu: 0.0.40
codegen_flags: <defaults>
</compile_context>

<pallas_src>
import jax
import jax.numpy as jnp
from jax.experimental import pallas as pl
from jax.experimental.pallas import tpu as pltpu


# --------------------------------------------------------------------------- #
# Pallas kernel
# --------------------------------------------------------------------------- #
def _erf_f32(x):
    """erf(x) via Abramowitz & Stegun 7.1.26 (max abs error ~1.5e-7).

    Uses only add/mul/div/exp/where so it lowers cleanly on Mosaic.
    """
    p = 0.3275911
    a1, a2, a3, a4, a5 = (0.254829592, -0.284496736, 1.421413741,
                          -1.453152027, 1.061405429)
    sign = jnp.where(x >= 0.0, 1.0, -1.0)
    ax = jnp.abs(x)
    # Exact divide kept on purpose: pl.reciprocal(approx=True) would move this
    # to the EUP slot but loosens the erf bound beyond the 1e-4 check budget.
    t = 1.0 / (1.0 + p * ax)
    poly = ((((a5 * t + a4) * t + a3) * t + a2) * t + a1) * t
    return sign * (1.0 - poly * jnp.exp(-(ax * ax)))


def _bert_intermediate_kernel(x_ref, w_ref, b_ref, o_ref):
    """Fused dense + bias + exact GELU on one (tm, H) x (H, tn) tile pair.

    x_ref : (tm, H)   input rows
    w_ref : (H, tn)   column tile of the (already transposed) dense weight
    b_ref : (1, tn)   column tile of the dense bias
    o_ref : (tm, tn)  output tile (lane-dense last dim)
    """
    y = jnp.dot(x_ref[...], w_ref[...], preferred_element_type=jnp.float32)
    y = y + b_ref[...].astype(jnp.float32)
    inv_sqrt2 = 0.7071067811865475
    gelu = y * (0.5 * (1.0 + _erf_f32(y * inv_sqrt2)))
    o_ref[...] = gelu.astype(o_ref.dtype)


# --------------------------------------------------------------------------- #
# Wrapper
# --------------------------------------------------------------------------- #
def convert_torch_linear_weight(weight):
    """PyTorch nn.Linear weight (I, H) -> (H, I); do this once at load time."""
    return jnp.transpose(weight)


def _round_up(x, m):
    return ((x + m - 1) // m) * m


def bert_intermediate(hidden_states, weight_t, bias, *,
                      tile_m=256, tile_n=512, compute_dtype=None):
    """hidden_states: (B, S, H); weight_t: (H, I) pre-transposed; bias: (I,).

    tile_m: rows per grid step (use ~512 on v6e, 256 on v7x, 128-256 on v5e).
    tile_n: intermediate columns per grid step (multiple of 128).
    compute_dtype: optional MXU operand dtype (e.g. jnp.bfloat16); f32 accum.
    """
    B, S, H = hidden_states.shape
    Hw, I = weight_t.shape
    assert Hw == H, (Hw, H)
    M = B * S

    x2d = hidden_states.reshape(M, H)
    b2d = bias.reshape(1, I)
    if compute_dtype is not None:
        x2d = x2d.astype(compute_dtype)
        weight_t = weight_t.astype(compute_dtype)

    # Row-tile selection: multiples of 8 sublanes; force >= 2 grid steps along
    # the "parallel" M axis when M >= 16 so both v7x TensorCores are used.
    if M < 16:
        tm = M                                   # full extent (single tile)
    else:
        tm = min(tile_m, _round_up(pl.cdiv(M, 2), 8))
        tm = min(tm, _round_up(M, 8))
    # Column tile: multiple of 128 lanes, or the full extent.
    tn = I if tile_n >= I else tile_n

    grid = (pl.cdiv(M, tm), pl.cdiv(I, tn))

    # Explicit scoped-VMEM budget from the real (double-buffered) footprint,
    # capped comfortably below v7x's 64 MiB physical VMEM.
    in_isz = x2d.dtype.itemsize
    out_isz = hidden_states.dtype.itemsize
    block_bytes = 2 * ((tm * H + H * tn) * in_isz
                       + tn * bias.dtype.itemsize
                       + tm * tn * out_isz)
    vmem_limit = int(min(max(2 * block_bytes, 32 << 20), 48 << 20))

    cost = pl.CostEstimate(
        flops=2 * M * H * I,
        transcendentals=M * I,                    # one exp per output element
        bytes_accessed=(M * H + H * I + I) * in_isz + M * I * out_isz,
    )

    out2d = pl.pallas_call(
        _bert_intermediate_kernel,
        out_shape=jax.ShapeDtypeStruct((M, I), hidden_states.dtype),
        grid_spec=pltpu.PrefetchScalarGridSpec(
            num_scalar_prefetch=0,
            grid=grid,
            in_specs=[
                pl.BlockSpec((tm, H), lambda i, j: (i, 0)),   # row tile
                pl.BlockSpec((H, tn), lambda i, j: (0, j)),   # weight col tile
                pl.BlockSpec((1, tn), lambda i, j: (0, j)),   # bias col tile
            ],
            out_specs=pl.BlockSpec((tm, tn), lambda i, j: (i, j)),
        ),
        compiler_params=pltpu.CompilerParams(
            dimension_semantics=("parallel", "parallel"),
            vmem_limit_bytes=vmem_limit,
        ),
        cost_estimate=cost,
    )(x2d, weight_t, b2d)

    return out2d.reshape(B, S, I)


# --------------------------------------------------------------------------- #
# Pure-JAX reference (mirrors the PyTorch module) for verification
# --------------------------------------------------------------------------- #
def _reference_forward(hidden_states, weight, bias):
    y = hidden_states @ weight.T + bias
    return jax.nn.gelu(y, approximate=False)   # exact erf GELU, as in BERT


# --------------------------------------------------------------------------- #
if __name__ == "__main__":
    # Small shapes consistent with the module: hidden_size=32,
    # intermediate_size=4*hidden_size=128, batch=2, seq=8.
    B, S, H, I = 2, 8, 32, 128

    key = jax.random.PRNGKey(0)
    kx, kw, kb = jax.random.split(key, 3)
    hidden_states = jax.random.normal(kx, (B, S, H), jnp.float32)
    weight = 0.05 * jax.random.normal(kw, (I, H), jnp.float32)   # (out, in)
    bias = 0.05 * jax.random.normal(kb, (I,), jnp.float32)

    # One-time (load-time) conversion of the PyTorch-layout weight.
    weight_t = convert_torch_linear_weight(weight)               # (H, I)

    out = jax.block_until_ready(bert_intermediate(hidden_states, weight_t, bias))
    assert out.shape == (B, S, I), out.shape

    ref = jax.block_until_ready(_reference_forward(hidden_states, weight, bias))
    max_err = float(jnp.max(jnp.abs(out - ref)))
    assert jnp.allclose(out, ref, rtol=1e-4, atol=1e-4), max_err

    print("KERNEL_OK")
</pallas_src>

<mosaic_0001>
module attributes {stable_mosaic.version = 11 : i64} {
  func.func @_bert_intermediate_kernel(%arg0: i32, %arg1: i32, %arg2: memref<8x32xf32, #tpu.memory_space<vmem>>, %arg3: memref<32x128xf32, #tpu.memory_space<vmem>>, %arg4: memref<1x128xf32, #tpu.memory_space<vmem>>, %arg5: memref<8x128xf32, #tpu.memory_space<vmem>>) attributes {dimension_semantics = [#tpu.dimension_semantics<parallel>, #tpu.dimension_semantics<parallel>], iteration_bounds = array<i64: 2, 1>, scalar_prefetch = 0 : i64, scratch_operands = 0 : i64, tpu.core_type = #tpu.core_type<tc>, window_params = [{transform_indices = @transform_0, window_bounds = array<i64: 8, 32>}, {transform_indices = @transform_1, window_bounds = array<i64: 32, 128>}, {transform_indices = @transform_2, window_bounds = array<i64: 1, 128>}, {transform_indices = @transform_3, window_bounds = array<i64: 8, 128>}]} {
    %c0 = arith.constant 0 : index
    %c0_0 = arith.constant 0 : index
    %0 = vector.load %arg2[%c0, %c0_0] : memref<8x32xf32, #tpu.memory_space<vmem>>, vector<8x32xf32>
    %c0_1 = arith.constant 0 : index
    %c0_2 = arith.constant 0 : index
    %1 = vector.load %arg3[%c0_1, %c0_2] : memref<32x128xf32, #tpu.memory_space<vmem>>, vector<32x128xf32>
    %cst = arith.constant dense<0.000000e+00> : vector<8x128xf32>
    %2 = tpu.matmul %0, %1, %cst {dimension_numbers = #tpu.dot_dimension_numbers<[1], [0], [0], [1], [0, 0, 1, 1], [], []>} : vector<8x32xf32>, vector<32x128xf32>, vector<8x128xf32> -> vector<8x128xf32>
    %c0_3 = arith.constant 0 : index
    %c0_4 = arith.constant 0 : index
    %3 = vector.load %arg4[%c0_3, %c0_4] : memref<1x128xf32, #tpu.memory_space<vmem>>, vector<1x128xf32>
    %4 = vector.broadcast %3 : vector<1x128xf32> to vector<8x128xf32>
    %5 = arith.addf %2, %4 : vector<8x128xf32>
    %cst_5 = arith.constant 0.707106769 : f32
    %6 = vector.broadcast %cst_5 : f32 to vector<8x128xf32>
    %7 = arith.mulf %5, %6 : vector<8x128xf32>
    %cst_6 = arith.constant 0.000000e+00 : f32
    %8 = vector.broadcast %cst_6 : f32 to vector<8x128xf32>
    %9 = arith.cmpf oge, %7, %8 : vector<8x128xf32>
    %cst_7 = arith.constant 1.000000e+00 : f32
    %cst_8 = arith.constant -1.000000e+00 : f32
    %10 = vector.broadcast %cst_7 : f32 to vector<8x128xf32>
    %11 = vector.broadcast %cst_8 : f32 to vector<8x128xf32>
    %12 = arith.select %9, %10, %11 : vector<8x128xi1>, vector<8x128xf32>
    %13 = math.absf %7 : vector<8x128xf32>
    %cst_9 = arith.constant 0.327591091 : f32
    %14 = vector.broadcast %cst_9 : f32 to vector<8x128xf32>
    %15 = arith.mulf %14, %13 : vector<8x128xf32>
    %cst_10 = arith.constant 1.000000e+00 : f32
    %16 = vector.broadcast %cst_10 : f32 to vector<8x128xf32>
    %17 = arith.addf %16, %15 : vector<8x128xf32>
    %cst_11 = arith.constant 1.000000e+00 : f32
    %18 = vector.broadcast %cst_11 : f32 to vector<8x128xf32>
    %19 = arith.divf %18, %17 : vector<8x128xf32>
    %cst_12 = arith.constant 1.06140542 : f32
    %20 = vector.broadcast %cst_12 : f32 to vector<8x128xf32>
    %21 = arith.mulf %20, %19 : vector<8x128xf32>
    %cst_13 = arith.constant -1.45315206 : f32
    %22 = vector.broadcast %cst_13 : f32 to vector<8x128xf32>
    %23 = arith.addf %21, %22 : vector<8x128xf32>
    %24 = arith.mulf %23, %19 : vector<8x128xf32>
    %cst_14 = arith.constant 1.42141378 : f32
    %25 = vector.broadcast %cst_14 : f32 to vector<8x128xf32>
    %26 = arith.addf %24, %25 : vector<8x128xf32>
    %27 = arith.mulf %26, %19 : vector<8x128xf32>
    %cst_15 = arith.constant -0.284496725 : f32
    %28 = vector.broadcast %cst_15 : f32 to vector<8x128xf32>
    %29 = arith.addf %27, %28 : vector<8x128xf32>
    %30 = arith.mulf %29, %19 : vector<8x128xf32>
    %cst_16 = arith.constant 0.254829586 : f32
    %31 = vector.broadcast %cst_16 : f32 to vector<8x128xf32>
    %32 = arith.addf %30, %31 : vector<8x128xf32>
    %33 = arith.mulf %32, %19 : vector<8x128xf32>
    %34 = arith.mulf %13, %13 : vector<8x128xf32>
    %cst_17 = arith.constant 0.000000e+00 : f32
    %35 = vector.broadcast %cst_17 : f32 to vector<8x128xf32>
    %36 = arith.subf %35, %34 : vector<8x128xf32>
    %37 = math.exp %36 : vector<8x128xf32>
    %38 = arith.mulf %33, %37 : vector<8x128xf32>
    %cst_18 = arith.constant 1.000000e+00 : f32
    %39 = vector.broadcast %cst_18 : f32 to vector<8x128xf32>
    %40 = arith.subf %39, %38 : vector<8x128xf32>
    %41 = arith.mulf %12, %40 : vector<8x128xf32>
    %cst_19 = arith.constant 1.000000e+00 : f32
    %42 = vector.broadcast %cst_19 : f32 to vector<8x128xf32>
    %43 = arith.addf %42, %41 : vector<8x128xf32>
    %cst_20 = arith.constant 5.000000e-01 : f32
    %44 = vector.broadcast %cst_20 : f32 to vector<8x128xf32>
    %45 = arith.mulf %44, %43 : vector<8x128xf32>
    %46 = arith.mulf %5, %45 : vector<8x128xf32>
    %c0_21 = arith.constant 0 : index
    %c0_22 = arith.constant 0 : index
    %47 = vector.load %arg5[%c0_21, %c0_22] : memref<8x128xf32, #tpu.memory_space<vmem>>, vector<8x128xf32>
    tpu.vector_store %arg5[%c0_21, %c0_22], %46 {strides = array<i32>} : memref<8x128xf32, #tpu.memory_space<vmem>>, vector<8x128xf32>,
    return
  }
  func.func @transform_0(%arg0: i32, %arg1: i32) -> (i32, i32) {
    %c0_i32 = arith.constant 0 : i32
    %c0_i32_0 = arith.constant 0 : i32
    return %arg0, %c0_i32 : i32, i32
  }
  func.func @transform_1(%arg0: i32, %arg1: i32) -> (i32, i32) {
    %c0_i32 = arith.constant 0 : i32
    %c0_i32_0 = arith.constant 0 : i32
    return %c0_i32, %arg1 : i32, i32
  }
  func.func @transform_2(%arg0: i32, %arg1: i32) -> (i32, i32) {
    %c0_i32 = arith.constant 0 : i32
    %c0_i32_0 = arith.constant 0 : i32
    return %c0_i32, %arg1 : i32, i32
  }
  func.func @transform_3(%arg0: i32, %arg1: i32) -> (i32, i32) {
    %c0_i32 = arith.constant 0 : i32
    return %arg0, %arg1 : i32, i32
  }
}

</mosaic_0001>

<bundles_post_ra>
// kernel: tpu_custom_call.1
= control target key start
LH: loop header
LB: loop body
LE: loop exit
PB: predicated region body
PF: predicated region fallthrough
CT: control target
= control target key end

     0   :  { %8 = vsyncpa [#allocation3], 0  ;;  %s926_s0 = inlined_call_operand.hbm [shape: f32[16,32], index: 0, kind: input, shape index: {}]   ;;  %s927_s1 = inlined_call_operand.hbm [shape: f32[32,128], index: 1, kind: input, shape index: {}]   ;;  %s928_s2 = inlined_call_operand.vmem [shape: f32[1,128], index: 2, kind: input, shape index: {}]   ;;  %s929_s3 = inlined_call_operand.hbm [shape: f32[16,128], index: 3, kind: output, shape index: {}]  }
   0x1   :  { %10 = vsyncpa [#allocation3 + $0x1], 0 }
   0x2   :  { %11 = vsyncpa [#allocation6], 0 }
   0x3   :  { %12 = vsyncpa [#allocation4], 0 }
   0x4   :  { %14 = vsyncpa [#allocation4 + $0x1], 0  ;;  %s752_s12 = smov 0   ;;  %s754_s13 = smov 0  }
   0x5   :  { %s756_s14 = smov 0   ;;  %s758_s15 = smov 0  }
   0x6   :  { %s760_s16 = smov 0   ;;  %s762_s17 = smov 0  }
   0x7 LB: > { %s468_s18 = sadd.s32 4294967295, %s722_s17   ;;  %s469_s19 = sadd.s32 4294967294, %s722_s17   ;;  %s722_s17 = sphi %s762_s17, %s20_s17   ;;  %s718_s16 = sphi %s760_s16, %s947_s16   ;;  %s714_s15 = sphi %s758_s15, %s946_s15   ;;  %s710_s14 = sphi %s756_s14, %s945_s14   ;;  %s706_s13 = sphi %s754_s13, %s944_s13   ;;  %s702_s12 = sphi %s752_s12, %s943_s12  }
   0x8   : > { %p52_p0 = scmp.ne.s32.totalorder %s706_s13, %s702_s12  ;;  %p786_p1 = scmp.eq.s32.totalorder %s468_s18, 0 }
   0x9   : > { %p790_p2 = scmp.eq.s32.totalorder %s468_s18, 1  ;;  %p136_p3 = scmp.eq.s32.totalorder %s469_s19, 1 }
   0xa   : > { %p796_p4 = por %p786_p1, %p52_p0  ;;  %p470_p5 = scmp.ge.s32.totalorder %s722_s17, 1 }
   0xb   : > { %p801_p6 = por %p136_p3, %p52_p0  ;;  %p143_p7 = scmp.lt.s32.totalorder %s722_s17, 3 }
   0xc   : > { %s933_s22 = scalar_select %p796_p4, 1, 0 }
   0xd   : > { %s934_s23 = scalar_select %p801_p6, 1, 0 }
   0xe   : > { %p806_p8 = pnand %p470_p5, %p143_p7  ;;  %s724_s25 = smov [#allocation5]  }
   0xf   : > { %s157_s26 = sshll.u32 %s724_s25, 4  ;;  %s32_s28 = sadd.s32 1, %s718_s16  ;;  %s158_s26 = int_to_ptr.vmem [resolvable:$true] %s157_s26 }
  0x10   : > { %p510_p9 = pneg %p806_p8  ;;  %s595_s29 = scalar_lea.vmem %s158_s26, 512 }
  0x11   : > { %p596_p13 = scmp.ne.s32.totalorder %s158_s26, %s595_s29  ;;  %p603_p5 = scmp.lt.s32.totalorder %s158_s26, %s158_s26 }
  0x12   : > { %p815_p11 = pnand %p510_p9, %p786_p1  ;;  %p604_p7 = scmp.lt.s32.totalorder %s595_s29, %s595_s29 }
  0x14   : > { %p586_p12 = pneg %p815_p11  ;;  %p605_p6 = por %p604_p7, %p603_p5 }
  0x16   : > { %p598_p0 = pnand %p596_p13, %p586_p12 }
  0x18   : > { %p599_p3 = pneg %p598_p0 }
  0x1a   : > { %p606_p4 = pnand %p605_p6, %p599_p3 }
  0x1c   : > { %609 = shalt.err (!%p606_p4)
}
  0x1d   : > { %s725_s30 = smov 128   ;;  %s726_s4 = smov 8  }
  0x1e   : > { %513 = dma.hbm_to_vmem [thread:$0]  (!%p815_p11), %s927_s1, 512, %s158_s26, [#allocation6], %s725_s30, %s725_s30, %s726_s4  }
  0x1f   : > { %p34_p6 = scmp.ge.s32.totalorder %s32_s28, 2  ;;  %s39_s7 = sadd.s32 1, %s710_s14 }
  0x20   : > { %p46_p4 = scmp.ne.s32.totalorder %s710_s14, %s706_s13  ;;  %p47_p9 = scmp.eq.s32.totalorder %s722_s17, 0 }
  0x21   : > { %s949_s28 = smov (%p34_p6, %s32_s28), 0  ;;  %p523_p0 = scmp.lt.s32.totalorder %s722_s17, 2 }
  0x22   : > { %p833_p12 = por %p47_p9, %p46_p4  ;;  %p839_p13 = por %p790_p2, %p46_p4 }
  0x23   : > { %s36_s10 = ssub.s32 %s718_s16, %s949_s28  ;;  %s177_s11 = sand.u32 1, %s710_s14  }
  0x24   : > { %p37_p11 = scmp.eq.s32.totalorder %s36_s10, 0  ;;  %s474_s18 = sshll.u32 %s177_s11, 3 }
  0x25   : > { %s475_s25 = sshll.u32 %s718_s16, 7  ;;  %s181_s30 = scalar_lea.vmem [#allocation2], %s474_s18 }
  0x26   : > { %s848_s19 = scalar_select %p37_p11, %s710_s14, %s39_s7  }
  0x27   : > { %s186_s29 = scalar_lea.hbm %s926_s0, %s475_s25  ;;  %s188_s4 = sshll.u32 %s181_s30, 4  ;;  %s189_s4 = int_to_ptr.vmem [resolvable:$true] %s188_s4 }
  0x28   : > { %p856_p2 = pnand %p523_p0, %p833_p12  ;;  %s178_s5 = scalar_lea.sflag [#allocation3], %s177_s11 }
  0x29   : > { %s623_s6 = scalar_lea.vmem %s189_s4, 128  ;;  %s727_s7 = smov [#allocation2]  }
  0x2a   : > { %p612_p3 = pneg %p856_p2  ;;  %p624_p5 = scmp.ne.s32.totalorder %s189_s4, %s623_s6 }
  0x2b   : > { %s628_s10 = sshll.u32 %s727_s7, 4  ;;  %s629_s10 = int_to_ptr.vmem [resolvable:$false] %s628_s10 }
  0x2c   : > { %p626_p7 = pnand %p624_p5, %p612_p3  ;;  %s630_s25 = scalar_lea.vmem %s629_s10, 256 }
  0x2d   : > { %p631_p4 = scmp.lt.s32.totalorder %s189_s4, %s629_s10  ;;  %p632_p9 = scmp.lt.s32.totalorder %s630_s25, %s623_s6 }
  0x2e   : > { %p627_p6 = pneg %p626_p7 }
  0x2f   : > { %p633_p11 = por %p632_p9, %p631_p4 }
  0x31   : > { %p634_p10 = pnand %p633_p11, %p627_p6 }
  0x33   : > { %637 = shalt.err (!%p634_p10)
}
  0x34   : > { %517 = dma.hbm_to_vmem [thread:$0]  (!%p856_p2), %s186_s29, 128, %s189_s4, %s178_s5  }
  0x35   : > { %197 = sbr.rel (%p806_p8) target bundleno = 330 (0x14a), region = 32  ;;  %s867_s8 = sand.u32 (!%p806_p8), 1, %s706_s13  }
  0x36   : > { %s477_s11 = sshll.u32 (!%p806_p8), %s867_s8, 3  ;;  %s200_s18 = scalar_lea.sflag (!%p806_p8), [#allocation3], %s867_s8 }
  0x37   : > { %s203_s26 = scalar_lea.vmem (!%p806_p8), [#allocation2], %s477_s11  ;;  %p940_p12 = scmp.ne.s32.totalorder (!%p806_p8), %s933_s22, 0 }
  0x3a   : > { %689 = dma.done.wait (%p940_p12), %s200_s18, 128  }
  0x3b   : > { %691 = vsyncadd (%p940_p12), %s200_s18, 4294967168 }
  0x3c   : > { %693 = dma.done.wait (%p786_p1), [#allocation6], 512  }
  0x3d   : > { %695 = vsyncadd (%p786_p1), [#allocation6], 4294966784  ;;  %v728_v0 = vmov 0.0   ;;  %vm729_vm0 = vmmov 0   ;;  %v240_v1 = vld [vmem:[#allocation5 + $0x18] sm:$0xff]  ;;  %v239_v2 = vld [vmem:[#allocation5 + $0x10] sm:$0xff] }
  0x3e   : > { %491 = vmatprep.subr.mxu0 %v728_v0  ;;  %499 = vmatprep.mubr.msk.f32.mxu0 %vm729_vm0, %v728_v0  ;;  %v238_v3 = vld [vmem:[#allocation5 + $0x8] sm:$0xff]  ;;  %v237_v4 = vld [vmem:[#allocation5] sm:$0xff]  ;;  %v236_v5 = vld [vmem:[%s203_s26] sm:$0xff]  ;;  %vm248_vm1 = vcmask 261120   ;;  %v730_v30 = vmov -1.0   ;;  %s483_s24 = sshll.u32 %s714_s15, 7 }
  0x3f   : > { %492 = vmatpush3.msra.mxu0 %v240_v1  ;;  %v480_v6 = vld [vmem:[%s928_s2] ss:$0 sm:$0xff]  ;;  %s232_s27 = scalar_lea.vmem [#allocation7], %s477_s11  ;;  %s363_s21 = scalar_lea.hbm %s929_s3, %s483_s24 }
  0x40   : > { %493 = vmatprep.subr.mxu0 %v728_v0  ;;  %s365_s29 = sshll.u32 %s232_s27, 4  ;;  %s351_s5 = scalar_lea.sflag [#allocation4], %s867_s8  ;;  %s366_s29 = int_to_ptr.vmem [resolvable:$true] %s365_s29 }
  0x41   : > { %494 = vmatpush3.msra.mxu0 %v239_v2  ;;  %s638_s6 = scalar_lea.vmem %s366_s29, 128  ;;  %s731_s7 = smov [#allocation7]  }
  0x42   : > { %495 = vmatprep.subr.mxu0 %v728_v0  ;;  %p639_p1 = scmp.ne.s32.totalorder %s366_s29, %s638_s6  ;;  %s642_s10 = sshll.u32 %s731_s7, 4  ;;  %s643_s10 = int_to_ptr.vmem [resolvable:$false] %s642_s10 }
  0x43   : > { %496 = vmatpush3.msra.mxu0 %v238_v3  ;;  %s644_s15 = scalar_lea.vmem %s643_s10, 256  ;;  %p645_p0 = scmp.lt.s32.totalorder %s366_s29, %s643_s10 }
  0x44   : > { %497 = vmatprep.subr.mxu0 %v728_v0  ;;  %p640_p8 = pnand %p639_p1, %p839_p13  ;;  %p646_p2 = scmp.lt.s32.totalorder %s644_s15, %s638_s6 }
  0x45   : > { %498 = vmatpush3.msra.mxu0 %v237_v4 }
  0x46   : > { %500 = vmatmul.mubr.msk.f32.vlgmr.msra.gmra.mxu0 %vm248_vm1, %v236_v5  ;;  %p641_p10 = pneg %p640_p8  ;;  %p647_p3 = por %p646_p2, %p645_p0 }
  0x48   : > { %p648_p5 = pnand %p647_p3, %p641_p10 }
 0x106   : > { %v318_v7 = vpop.f32.mrf.mxu0 }
 0x107   : > { %v319_v8 = vadd.f32 %v480_v6, %v318_v7 }
 0x108   : > { %v501_v9 = vpop.f32.mrf.mxu0 }
 0x109   : > { %v322_v10 = vmul.f32 0.70710677, %v319_v8 }
 0x10b   : > { %v325_v11 = vand.u32 2147483647, %v322_v10  ;;  %vm323_vm2 = vcmp.ge.f32.partialorder %v322_v10, 0.0 }
 0x10c   : > { %v324_v31 = vsel %vm323_vm2, 1.0, %v730_v30 }
 0x10d   : > { %v326_v12 = vmul.f32 0.3275911, %v325_v11  ;;  %v339_v14 = vmul.f32 %v325_v11, %v325_v11 }
 0x10f   : > { %v327_v13 = vadd.f32 1.0, %v326_v12  ;;  %v340_v15 = vsub.f32 0.0, %v339_v14 }
 0x111   : > { %580 = vrcp.f32 %v327_v13  ;;  %v341_v18 = vmul.f32 1.442695, %v340_v15 }
 0x113   : > { %582 = vpow2.f32 %v341_v18 }
 0x11e   : > { %v581_v16 = vpop.eup %580 }
 0x11f   : > { %v330_v17 = vmul.f32 1.0614054, %v581_v16 }
 0x120   : > { %v583_v27 = vpop.eup %582 }
 0x121   : > { %v331_v19 = vadd.f32 -1.4531521, %v330_v17 }
 0x123   : > { %v332_v20 = vmul.f32 %v581_v16, %v331_v19 }
 0x125   : > { %v333_v21 = vadd.f32 1.4214138, %v332_v20 }
 0x127   : > { %v334_v22 = vmul.f32 %v581_v16, %v333_v21 }
 0x129   : > { %v335_v23 = vadd.f32 -0.28449672, %v334_v22 }
 0x12b   : > { %v336_v24 = vmul.f32 %v581_v16, %v335_v23 }
 0x12d   : > { %v337_v25 = vadd.f32 0.2548296, %v336_v24 }
 0x12f   : > { %v338_v26 = vmul.f32 %v581_v16, %v337_v25 }
 0x131   : > { %v343_v28 = vmul.f32 %v583_v27, %v338_v26 }
 0x133   : > { %v344_v29 = vsub.f32 1.0, %v343_v28 }
 0x135   : > { %v345_v32 = vmul.f32 %v344_v29, %v324_v31 }
 0x137   : > { %v346_v33 = vadd.f32 1.0, %v345_v32 }
 0x139   : > { %v347_v34 = vmul.f32 0.5, %v346_v33 }
 0x13b   : > { %v348_v35 = vmul.f32 %v347_v34, %v319_v8 }
 0x13d   : > { %349 = vst [vmem:[%s232_s27] sm:$0xff] %v348_v35 }
 0x13e   : > { %651 = shalt.err (!%p648_p5)
}
 0x13f   : > { %s652_s25 = scalar_lea.hbm %s363_s21, 128  ;;  %s656_s18 = scalar_lea.hbm %s929_s3, 256 }
 0x140   : > { %p653_p7 = scmp.ne.s32.totalorder %s363_s21, %s652_s25  ;;  %p657_p9 = scmp.lt.s32.totalorder %s363_s21, %s929_s3 }
 0x141   : > { %p658_p11 = scmp.lt.s32.totalorder %s656_s18, %s652_s25 }
 0x142   : > { %p654_p6 = pnand %p653_p7, %p839_p13 }
 0x143   : > { %p659_p12 = por %p658_p11, %p657_p9 }
 0x144   : > { %p655_p4 = pneg %p654_p6 }
 0x146   : > { %p660_p1 = pnand %p659_p12, %p655_p4 }
 0x148   : > { %663 = shalt.err (!%p660_p1)
}
 0x149   : > { %508 = dma.vmem_to_hbm [thread:$0]  (%p839_p13), %s366_s29, 128, %s363_s21, %s351_s5  }
 0x14a PF: > { %s377_s22 = sand.u32 1, %s702_s12   ;;  %p941_p8 = scmp.ne.s32.totalorder %s934_s23, 0 }
 0x14b   : > { %p942_p10 = scmp.ge.s32.totalorder %s722_s17, 2  ;;  %s378_s24 = scalar_lea.sflag [#allocation4], %s377_s22 }
 0x14d   : > { %p519_p0 = pnand %p942_p10, %p941_p8 }
 0x14f   : > { %p520_p2 = pneg %p519_p0 }
 0x151   : > { %697 = dma.done.wait (%p520_p2), %s378_s24, 128  }
 0x152   : > { %699 = vsyncadd (%p520_p2), %s378_s24, 4294967168  ;;  %s20_s17 = sadd.s32 1, %s722_s17   ;;  %s943_s12 = smov %s706_s13 }
 0x153   : > { %p17_p3 = scmp.ge.s32.totalorder %s20_s17, 4   ;;  %s944_s13 = smov %s710_s14 }
 0x154   : > { %s945_s14 = smov %s848_s19  ;;  %s946_s15 = smov %s718_s16 }
 0x155   : > { %s947_s16 = smov %s949_s28  ;;  %19 = sbr.rel (!%p17_p3) target bundleno = 7 (0x7), region = 85 }
 0x15a   :  { %383 = vsyncpa [#allocation3], 1 }
 0x15b   :  { %385 = vsyncpa [#allocation3 + $0x1], 1 }
 0x15c   :  { %386 = vsyncpa [#allocation6], 1 }
 0x15d   :  { %387 = vsyncpa [#allocation4], 1 }
 0x15e   :  { %389 = vsyncpa [#allocation4 + $0x1], 1 }

</bundles_post_ra>
